<compile_context>
chip_gen: v7x
topology: tpu7x:2x2x1
jax: 0.10.0
libtpu: 0.0.40
codegen_flags: <defaults>
</compile_context>

<pallas_src>
import math

import jax
import jax.numpy as jnp
from jax.experimental import pallas as pl
from jax.experimental.pallas import tpu as pltpu


# ----------------------------- hardware helpers ------------------------------ #

def _preferred_mxu_width():
    """128 for v2-v5 (128x128 MXU), 256 for v6e/v7x (256x256 MXU)."""
    try:
        kind = jax.devices()[0].device_kind.lower()
    except Exception:
        return 256
    for tag in ("v2", "v3", "v4", "v5"):
        if tag in kind:
            return 128
    return 256


def _vmem_limit_bytes():
    """Generation-aware scoped-VMEM budget (leave 25% headroom)."""
    try:
        cap = int(pltpu.get_tpu_info().vmem_capacity_bytes)
    except Exception:
        cap = 64 << 20          # conservative (v7x per-TensorCore VMEM)
    cap = min(cap, 128 << 20)
    return (cap * 3) // 4


def _pick_m_tile(M, c, mxu_width):
    """FLOP-minimal lane-dense tile over the M = B*c*T axis.

    The block-diagonal channel-mix pads its contraction to the MXU width
    anyway, so m_tile == MXU width is FLOP-minimal.  Prefer a tile giving
    >= 2 grid steps so dimension_semantics=("parallel",) can actually split
    work across v7x's two TensorCores.  Never return M itself -- the caller
    zero-pads M up to a multiple of the returned tile.
    """
    cands = []
    for t in (mxu_width, 128):
        if t % c == 0 and t not in cands:
            cands.append(t)
    if not cands:                       # c does not divide the MXU width
        g = math.gcd(c, 128)
        cands = [(c // g) * 128]        # smallest 128-multiple divisible by c
    for t in cands:
        if M % t == 0 and M // t >= 2:
            return t
    for t in cands:
        if M % t == 0:
            return t
    return cands[-1]


# --------------------------------- kernels ---------------------------------- #

def _align_conv_kernel(w_ref, b_ref, x_ref, o_ref):
    # Per-batch 1x1 "align" conv: [c_out, c_in] @ [c_in, T*N] + bias_col.
    # Lane axis is T*N (lane-dense stores); weight/bias are tiny residents.
    o_ref[...] = (
        jnp.dot(w_ref[...], x_ref[...], preferred_element_type=jnp.float32)
        + b_ref[...]
    )


def _make_cheb_kernel(Ks):
    # Fully fused ChebConv + bias + residual.  Ks is a static Python int so
    # the recursion is unrolled at trace time; x_{k-1}/x_{k-2}/acc are VMEM
    # values that never round-trip HBM.
    def kernel(l_ref, x0_ref, w_ref, b_ref, o_ref):
        x0 = x0_ref[...]
        acc = jnp.dot(x0, w_ref[0], preferred_element_type=jnp.float32)
        if Ks > 1:
            L = l_ref[...]
            x_km2 = x0
            x_km1 = jnp.dot(L, x0, preferred_element_type=jnp.float32)
            acc = acc + jnp.dot(x_km1, w_ref[1], preferred_element_type=jnp.float32)
            for k in range(2, Ks):                      # static unroll
                x_k = (2.0 * jnp.dot(L, x_km1, preferred_element_type=jnp.float32)
                       - x_km2)
                acc = acc + jnp.dot(x_k, w_ref[k],
                                    preferred_element_type=jnp.float32)
                x_km2, x_km1 = x_km1, x_k
        # Bias + residual fused into the single lane-dense store (VPU filler).
        o_ref[...] = acc + b_ref[...] + x0
    return kernel


def _gcn_kernel(l_ref, x0_ref, w_ref, b_ref, o_ref):
    # Fused GCNConv:  out = L @ (X0 @ W_blockdiag) + bias + X0
    x0 = x0_ref[...]
    first = jnp.dot(x0, w_ref[...], preferred_element_type=jnp.float32)
    second = jnp.dot(l_ref[...], first, preferred_element_type=jnp.float32)
    o_ref[...] = second + b_ref[...] + x0


# ----------------------------- kernel wrappers ------------------------------- #

def align_conv(w, bias_col, x3d, *, vmem_limit):
    """Per-batch 1x1 conv: out[b] = W[c_out,c_in] @ x[b][c_in,T*N] + bias."""
    B, c_in, TN = x3d.shape
    c_out = w.shape[0]
    # TODO(synk): if T*N grows very large, add a 128-multiple lane grid over
    # T*N as well (v5e scoped-VMEM headroom); per-batch blocks suffice here.
    return pl.pallas_call(
        _align_conv_kernel,
        out_shape=jax.ShapeDtypeStruct((B, c_out, TN), jnp.float32),
        grid=(B,),
        in_specs=[
            pl.BlockSpec((c_out, c_in), lambda b: (0, 0)),      # W resident
            pl.BlockSpec((c_out, 1), lambda b: (0, 0)),         # bias resident
            pl.BlockSpec((None, c_in, TN), lambda b: (b, 0, 0)),  # x[b]
        ],
        out_specs=pl.BlockSpec((None, c_out, TN), lambda b: (b, 0, 0)),
        compiler_params=pltpu.CompilerParams(
            dimension_semantics=("parallel",),
            vmem_limit_bytes=vmem_limit),
    )(w, bias_col, x3d)


def cheb_graph_conv(L, x0, w_diag, bias_tile, *, Ks, m_tile, vmem_limit):
    """Fused Chebyshev graph conv over the raw [N, M_pad] view."""
    n, Mp = x0.shape
    grid = (Mp // m_tile,)
    return pl.pallas_call(
        _make_cheb_kernel(Ks),
        out_shape=jax.ShapeDtypeStruct((n, Mp), jnp.float32),
        grid=grid,
        in_specs=[
            pl.BlockSpec((n, n), lambda i: (0, 0)),                   # L resident
            pl.BlockSpec((n, m_tile), lambda i: (0, i)),              # X0 tile
            pl.BlockSpec((Ks, m_tile, m_tile), lambda i: (0, 0, 0)),  # W resident
            pl.BlockSpec((1, m_tile), lambda i: (0, 0)),              # bias resident
        ],
        out_specs=pl.BlockSpec((n, m_tile), lambda i: (0, i)),
        compiler_params=pltpu.CompilerParams(
            dimension_semantics=("parallel",),    # M tiles shard across TCs (v7x)
            vmem_limit_bytes=vmem_limit),
    )(L, x0, w_diag, bias_tile)


def gcn_graph_conv(L, x0, w_diag, bias_tile, *, m_tile, vmem_limit):
    """Fused GCN graph conv over the raw [N, M_pad] view."""
    n, Mp = x0.shape
    grid = (Mp // m_tile,)
    return pl.pallas_call(
        _gcn_kernel,
        out_shape=jax.ShapeDtypeStruct((n, Mp), jnp.float32),
        grid=grid,
        in_specs=[
            pl.BlockSpec((n, n), lambda i: (0, 0)),
            pl.BlockSpec((n, m_tile), lambda i: (0, i)),
            pl.BlockSpec((m_tile, m_tile), lambda i: (0, 0)),
            pl.BlockSpec((1, m_tile), lambda i: (0, 0)),
        ],
        out_specs=pl.BlockSpec((n, m_tile), lambda i: (0, i)),
        compiler_params=pltpu.CompilerParams(
            dimension_semantics=("parallel",),
            vmem_limit_bytes=vmem_limit),
    )(L, x0, w_diag, bias_tile)


# -------------------------------- the layer ---------------------------------- #

class GraphConvLayer:
    """JAX/Pallas re-implementation of the PyTorch GraphConvLayer forward."""

    def __init__(self, Ks, c_in, c_out, graph_conv_type, graph_conv_matrix, key,
                 graph_conv_act_func="relu"):
        self.Ks = Ks
        self.c_in = c_in
        self.c_out = c_out
        self.graph_conv_type = graph_conv_type
        self.graph_conv_matrix = graph_conv_matrix.astype(jnp.float32)
        self.graph_conv_act_func = graph_conv_act_func

        k_aw, k_ab, k_gc = jax.random.split(key, 3)

        # Align 1x1-conv params (used when c_in > c_out). torch conv default
        # init: U(-1/sqrt(fan_in), 1/sqrt(fan_in)).
        bnd = 1.0 / math.sqrt(c_in)
        self.align_w = jax.random.uniform(k_aw, (c_out, c_in), jnp.float32, -bnd, bnd)
        self.align_b = jax.random.uniform(k_ab, (c_out,), jnp.float32, -bnd, bnd)

        # Graph-conv weight: kaiming_uniform (relu-family activation) bound.
        if graph_conv_type == "chebconv":
            fan_in = c_out * c_out            # torch fan_in for [Ks, c_in, c_out]
            bound = math.sqrt(6.0 / fan_in)
            self.weight = jax.random.uniform(
                k_gc, (Ks, c_out, c_out), jnp.float32, -bound, bound)
        elif graph_conv_type == "gcnconv":
            fan_in = c_out
            bound = math.sqrt(6.0 / fan_in)
            self.weight = jax.random.uniform(
                k_gc, (c_out, c_out), jnp.float32, -bound, bound)
        else:
            raise ValueError(graph_conv_type)
        self.bias = jnp.zeros((c_out,), jnp.float32)   # init.zeros_

        self._mxu_width = _preferred_mxu_width()
        self._vmem_limit = _vmem_limit_bytes()

    # --- forward ---
    def __call__(self, x):
        B, _, T, N = x.shape
        c = self.c_out

        # ---------------- Align (prologue) ----------------
        if self.c_in > self.c_out:
            # Per-batch 1x1 conv as a Pallas matmul (no kron(I_B, W)):
            # [c_out, c_in] @ [c_in, T*N] per batch tile.
            x3d = x.reshape(B, self.c_in, T * N).astype(jnp.float32)
            bias_col = self.align_b[:, None]                         # [c_out, 1]
            aligned = align_conv(self.align_w, bias_col, x3d,
                                 vmem_limit=self._vmem_limit)
            # TODO(synk): check HLO for a relayout copy between this output
            # ([B, c_out, T*N] minor axis) and the [N, M] raw view below.
            x_gc_in = aligned.reshape(B, c, T, N)
        elif self.c_in < self.c_out:
            # TODO(synk): channel zero-padding is pure data movement; left as
            # a plain jnp.concatenate (no compute to put on the MXU/VPU).
            x_gc_in = jnp.concatenate(
                [x, jnp.zeros((B, c - self.c_in, T, N), x.dtype)], axis=1)
        else:
            x_gc_in = x

        M = B * c * T
        m_tile = _pick_m_tile(M, c, self._mxu_width)
        M_pad = ((M + m_tile - 1) // m_tile) * m_tile

        # Raw row-major reinterpretation == torch x.reshape(n_vertex, -1),
        # zero-padded on the M axis to a whole number of lane-dense tiles.
        x0 = x_gc_in.reshape(N, M).astype(jnp.float32)
        if M_pad != M:
            x0 = jnp.pad(x0, ((0, 0), (0, M_pad - M)))

        # Bias in the [N, M] layout: column m gets bias[m % c].
        bias_tile = jnp.tile(self.bias, m_tile // c)[None, :]        # [1, m_tile]
        eye_blk = jnp.eye(m_tile // c, dtype=jnp.float32)

        if self.graph_conv_type == "chebconv":
            # Per-k slice of weight.view(Ks*c, c_out) (rows k::Ks), expanded to
            # a block-diagonal [m_tile, m_tile] so the projection of x_k stays
            # in the lane-dense [N, M] layout.  At m_tile == MXU width the
            # extra block-diag FLOPs are hidden by MXU contraction padding.
            w2 = self.weight.reshape(self.Ks * c, self.c_out)
            w_diag = jnp.stack(
                [jnp.kron(eye_blk, w2[k::self.Ks]) for k in range(self.Ks)], axis=0)
            out2d = cheb_graph_conv(self.graph_conv_matrix, x0, w_diag, bias_tile,
                                    Ks=self.Ks, m_tile=m_tile,
                                    vmem_limit=self._vmem_limit)
        else:
            w_diag = jnp.kron(eye_blk, self.weight)                   # [m_tile, m_tile]
            out2d = gcn_graph_conv(self.graph_conv_matrix, x0, w_diag, bias_tile,
                                   m_tile=m_tile, vmem_limit=self._vmem_limit)

        if M_pad != M:
            out2d = out2d[:, :M]
        # out2d already includes bias + residual; reshape is a free raw view.
        return out2d.reshape(B, c, T, N)

    # --- pure-JAX reference (mirrors the PyTorch module, correctness only) ---
    def reference(self, x):
        B, _, T, N = x.shape
        if self.c_in > self.c_out:
            xg = (jnp.einsum("bitn,oi->botn", x, self.align_w)
                  + self.align_b[None, :, None, None])
        elif self.c_in < self.c_out:
            xg = jnp.concatenate(
                [x, jnp.zeros((B, self.c_out - self.c_in, T, N), x.dtype)], axis=1)
        else:
            xg = x
        c = self.c_out
        if self.graph_conv_type == "chebconv":
            x0 = xg.reshape(N, -1)
            x_list = [x0]
            if self.Ks > 1:
                x_list.append(self.graph_conv_matrix @ x0)
                for _ in range(2, self.Ks):
                    x_list.append(2.0 * self.graph_conv_matrix @ x_list[-1]
                                  - x_list[-2])
            xt = jnp.stack(x_list, axis=2)
            x_gc = (xt.reshape(-1, self.Ks * c) @ self.weight.reshape(self.Ks * c, c)
                    + self.bias)
        else:
            first = (xg.reshape(-1, c) @ self.weight).reshape(N, -1)
            x_gc = (self.graph_conv_matrix @ first).reshape(-1, c) + self.bias
        return x_gc.reshape(B, c, T, N) + xg


# ---------------------------------- main ------------------------------------- #

if __name__ == "__main__":
    key = jax.random.PRNGKey(0)
    k_x, k_A, k_l1, k_l2, k_x2 = jax.random.split(key, 5)

    B, T, N, Ks = 2, 8, 16, 3

    # deterministic normalized graph shift operator [N, N]
    A = jax.random.uniform(k_A, (N, N), jnp.float32)
    A = (A + A.T) * 0.5
    gso = A / jnp.sum(A, axis=1, keepdims=True)

    # --- chebconv path, c_in < c_out (Align = zero-pad): 1 fused pallas_call ---
    c_in, c_out = 4, 8
    x = jax.random.normal(k_x, (B, c_in, T, N), dtype=jnp.float32)
    layer = GraphConvLayer(Ks, c_in, c_out, "chebconv", gso, key=k_l1)
    out = jax.block_until_ready(layer(x))
    assert out.shape == (B, c_out, T, N)
    assert jnp.allclose(out, layer.reference(x), atol=1e-4, rtol=1e-4)

    # --- gcnconv path, c_in > c_out (Align = per-batch Pallas 1x1 conv): 2 calls ---
    c_in2, c_out2 = 8, 4
    x2 = jax.random.normal(k_x2, (B, c_in2, T, N), dtype=jnp.float32)
    layer2 = GraphConvLayer(Ks, c_in2, c_out2, "gcnconv", gso, key=k_l2)
    out2 = jax.block_until_ready(layer2(x2))
    assert out2.shape == (B, c_out2, T, N)
    assert jnp.allclose(out2, layer2.reference(x2), atol=1e-4, rtol=1e-4)

    print("KERNEL_OK")
</pallas_src>

<mosaic_0001>
module attributes {stable_mosaic.version = 11 : i64} {
  func.func @kernel(%arg0: i32, %arg1: memref<16x16xf32, #tpu.memory_space<vmem>>, %arg2: memref<16x128xf32, #tpu.memory_space<vmem>>, %arg3: memref<3x128x128xf32, #tpu.memory_space<vmem>>, %arg4: memref<1x128xf32, #tpu.memory_space<vmem>>, %arg5: memref<16x128xf32, #tpu.memory_space<vmem>>) attributes {dimension_semantics = [#tpu.dimension_semantics<parallel>], iteration_bounds = array<i64: 1>, scalar_prefetch = 0 : i64, scratch_operands = 0 : i64, tpu.core_type = #tpu.core_type<tc>, window_params = [{pipeline_mode = #tpu.pipeline_mode<synchronous>, transform_indices = @transform_0, window_bounds = array<i64: 16, 16>}, {transform_indices = @transform_1, window_bounds = array<i64: 16, 128>}, {pipeline_mode = #tpu.pipeline_mode<synchronous>, transform_indices = @transform_2, window_bounds = array<i64: 3, 128, 128>}, {pipeline_mode = #tpu.pipeline_mode<synchronous>, transform_indices = @transform_3, window_bounds = array<i64: 1, 128>}, {transform_indices = @transform_4, window_bounds = array<i64: 16, 128>}]} {
    %c0 = arith.constant 0 : index
    %c0_0 = arith.constant 0 : index
    %0 = vector.load %arg2[%c0, %c0_0] : memref<16x128xf32, #tpu.memory_space<vmem>>, vector<16x128xf32>
    %c0_1 = arith.constant 0 : index
    %c0_2 = arith.constant 0 : index
    %c0_3 = arith.constant 0 : index
    %1 = vector.load %arg3[%c0_1, %c0_2, %c0_3] : memref<3x128x128xf32, #tpu.memory_space<vmem>>, vector<1x128x128xf32>
    %2 = vector.shape_cast %1 : vector<1x128x128xf32> to vector<128x128xf32>
    %cst = arith.constant dense<0.000000e+00> : vector<16x128xf32>
    %3 = tpu.matmul %0, %2, %cst {dimension_numbers = #tpu.dot_dimension_numbers<[1], [0], [0], [1], [0, 0, 1, 1], [], []>} : vector<16x128xf32>, vector<128x128xf32>, vector<16x128xf32> -> vector<16x128xf32>
    %c0_4 = arith.constant 0 : index
    %c0_5 = arith.constant 0 : index
    %4 = vector.load %arg1[%c0_4, %c0_5] : memref<16x16xf32, #tpu.memory_space<vmem>>, vector<16x16xf32>
    %cst_6 = arith.constant dense<0.000000e+00> : vector<16x128xf32>
    %5 = tpu.matmul %4, %0, %cst_6 {dimension_numbers = #tpu.dot_dimension_numbers<[1], [0], [0], [1], [0, 0, 1, 1], [], []>} : vector<16x16xf32>, vector<16x128xf32>, vector<16x128xf32> -> vector<16x128xf32>
    %c1 = arith.constant 1 : index
    %c0_7 = arith.constant 0 : index
    %c0_8 = arith.constant 0 : index
    %6 = vector.load %arg3[%c1, %c0_7, %c0_8] : memref<3x128x128xf32, #tpu.memory_space<vmem>>, vector<1x128x128xf32>
    %7 = vector.shape_cast %6 : vector<1x128x128xf32> to vector<128x128xf32>
    %cst_9 = arith.constant dense<0.000000e+00> : vector<16x128xf32>
    %8 = tpu.matmul %5, %7, %cst_9 {dimension_numbers = #tpu.dot_dimension_numbers<[1], [0], [0], [1], [0, 0, 1, 1], [], []>} : vector<16x128xf32>, vector<128x128xf32>, vector<16x128xf32> -> vector<16x128xf32>
    %9 = arith.addf %3, %8 : vector<16x128xf32>
    %cst_10 = arith.constant dense<0.000000e+00> : vector<16x128xf32>
    %10 = tpu.matmul %4, %5, %cst_10 {dimension_numbers = #tpu.dot_dimension_numbers<[1], [0], [0], [1], [0, 0, 1, 1], [], []>} : vector<16x16xf32>, vector<16x128xf32>, vector<16x128xf32> -> vector<16x128xf32>
    %cst_11 = arith.constant 2.000000e+00 : f32
    %11 = vector.broadcast %cst_11 : f32 to vector<16x128xf32>
    %12 = arith.mulf %11, %10 : vector<16x128xf32>
    %13 = arith.subf %12, %0 : vector<16x128xf32>
    %c2 = arith.constant 2 : index
    %c0_12 = arith.constant 0 : index
    %c0_13 = arith.constant 0 : index
    %14 = vector.load %arg3[%c2, %c0_12, %c0_13] : memref<3x128x128xf32, #tpu.memory_space<vmem>>, vector<1x128x128xf32>
    %15 = vector.shape_cast %14 : vector<1x128x128xf32> to vector<128x128xf32>
    %cst_14 = arith.constant dense<0.000000e+00> : vector<16x128xf32>
    %16 = tpu.matmul %13, %15, %cst_14 {dimension_numbers = #tpu.dot_dimension_numbers<[1], [0], [0], [1], [0, 0, 1, 1], [], []>} : vector<16x128xf32>, vector<128x128xf32>, vector<16x128xf32> -> vector<16x128xf32>
    %17 = arith.addf %9, %16 : vector<16x128xf32>
    %c0_15 = arith.constant 0 : index
    %c0_16 = arith.constant 0 : index
    %18 = vector.load %arg4[%c0_15, %c0_16] : memref<1x128xf32, #tpu.memory_space<vmem>>, vector<1x128xf32>
    %19 = vector.broadcast %18 : vector<1x128xf32> to vector<16x128xf32>
    %20 = arith.addf %17, %19 : vector<16x128xf32>
    %21 = arith.addf %20, %0 : vector<16x128xf32>
    %c0_17 = arith.constant 0 : index
    %c0_18 = arith.constant 0 : index
    %22 = vector.load %arg5[%c0_17, %c0_18] : memref<16x128xf32, #tpu.memory_space<vmem>>, vector<16x128xf32>
    tpu.vector_store %arg5[%c0_17, %c0_18], %21 {strides = array<i32>} : memref<16x128xf32, #tpu.memory_space<vmem>>, vector<16x128xf32>,
    return
  }
  func.func @transform_0(%arg0: i32) -> (i32, i32) {
    %c0_i32 = arith.constant 0 : i32
    %c0_i32_0 = arith.constant 0 : i32
    %c0_i32_1 = arith.constant 0 : i32
    return %c0_i32, %c0_i32_0 : i32, i32
  }
  func.func @transform_1(%arg0: i32) -> (i32, i32) {
    %c0_i32 = arith.constant 0 : i32
    %c0_i32_0 = arith.constant 0 : i32
    return %c0_i32, %arg0 : i32, i32
  }
  func.func @transform_2(%arg0: i32) -> (i32, i32, i32) {
    %c0_i32 = arith.constant 0 : i32
    %c0_i32_0 = arith.constant 0 : i32
    %c0_i32_1 = arith.constant 0 : i32
    %c0_i32_2 = arith.constant 0 : i32
    return %c0_i32, %c0_i32_0, %c0_i32_1 : i32, i32, i32
  }
  func.func @transform_3(%arg0: i32) -> (i32, i32) {
    %c0_i32 = arith.constant 0 : i32
    %c0_i32_0 = arith.constant 0 : i32
    %c0_i32_1 = arith.constant 0 : i32
    return %c0_i32, %c0_i32_0 : i32, i32
  }
  func.func @transform_4(%arg0: i32) -> (i32, i32) {
    %c0_i32 = arith.constant 0 : i32
    %c0_i32_0 = arith.constant 0 : i32
    return %c0_i32, %arg0 : i32, i32
  }
}

</mosaic_0001>

<bundles_post_ra>
// kernel: tpu_custom_call.1
= control target key start
LH: loop header
LB: loop body
LE: loop exit
PB: predicated region body
PF: predicated region fallthrough
CT: control target
= control target key end

     0   :  { %9 = vsyncpa [#allocation3], 0  ;;  %s1051_s0 = inlined_call_operand.hbm [shape: f32[16,16], index: 0, kind: input, shape index: {}]   ;;  %s1052_s1 = inlined_call_operand.hbm [shape: f32[16,128], index: 1, kind: input, shape index: {}]   ;;  %s1053_s2 = inlined_call_operand.hbm [shape: f32[3,128,128], index: 2, kind: input, shape index: {}]   ;;  %s1054_s3 = inlined_call_operand.vmem [shape: f32[1,128], index: 3, kind: input, shape index: {}]   ;;  %s1055_s4 = inlined_call_operand.hbm [shape: f32[16,128], index: 4, kind: output, shape index: {}]  }
   0x1   :  { %10 = vsyncpa [#allocation6], 0 }
   0x2   :  { %11 = vsyncpa [#allocation4], 0  ;;  %s926_s15 = smov [#allocation5]   ;;  %s927_s17 = smov [#allocation2]  }
   0x3   :  { %s29_s16 = sshll.u32 %s926_s15, 4  ;;  %s17_s18 = sshll.u32 %s927_s17, 4  ;;  %s30_s16 = int_to_ptr.vmem [resolvable:$true] %s29_s16  ;;  %s957_s18 = int_to_ptr.vmem [resolvable:$true] %s17_s18 }
   0x4   :  { %s832_s21 = scalar_lea.hbm %s1052_s1, 256 }
   0x5   :  { %p833_p0 = scmp.ne.s32.totalorder %s1052_s1, %s832_s21  ;;  %p836_p1 = scmp.lt.u32.totalorder %s832_s21, %s1052_s1 }
   0x7   :  { %p838_p2 = pnand %p836_p1, %p833_p0 }
   0x9   :  { %841 = shalt.err (!%p838_p2)
}
   0xa   :  { %s842_s26 = scalar_lea.vmem %s30_s16, 256  ;;  %p847_p4 = scmp.lt.s32.totalorder %s30_s16, %s30_s16 }
   0xb   :  { %p843_p3 = scmp.ne.s32.totalorder %s30_s16, %s842_s26  ;;  %p848_p5 = scmp.lt.s32.totalorder %s842_s26, %s842_s26 }
   0xd   :  { %p849_p6 = por %p848_p5, %p847_p4 }
   0xf   :  { %p850_p7 = pnand %p849_p6, %p843_p3 }
  0x11   :  { %853 = shalt.err (!%p850_p7)
}
  0x12   :  { %s928_s27 = smov 128   ;;  %s929_s28 = smov 8  }
  0x13   :  { %35 = dma.hbm_to_vmem [thread:$0]  %s1052_s1, 256, %s30_s16, [#allocation6], %s928_s27, %s928_s27, %s929_s28  }
  0x14   :  { %s854_s7 = scalar_lea.hbm %s1051_s0, 256 }
  0x15   :  { %p855_p8 = scmp.ne.s32.totalorder %s1051_s0, %s854_s7  ;;  %p858_p9 = scmp.lt.u32.totalorder %s854_s7, %s1051_s0 }
  0x17   :  { %p860_p10 = pnand %p858_p9, %p855_p8 }
  0x19   :  { %863 = shalt.err (!%p860_p10)
}
  0x1a   :  { %s864_s12 = scalar_lea.vmem %s957_s18, 256  ;;  %p869_p12 = scmp.lt.s32.totalorder %s957_s18, %s957_s18 }
  0x1b   :  { %p865_p11 = scmp.ne.s32.totalorder %s957_s18, %s864_s12  ;;  %p870_p13 = scmp.lt.s32.totalorder %s864_s12, %s864_s12 }
  0x1d   :  { %p871_p0 = por %p870_p13, %p869_p12 }
  0x1f   :  { %p872_p1 = pnand %p871_p0, %p865_p11 }
  0x21   :  { %875 = shalt.err (!%p872_p1)
}
  0x22   :  { %23 = dma.hbm_to_vmem [thread:$0]  %s1051_s0, 256, %s957_s18, [#allocation3], %s928_s27, %s928_s27, %s929_s28  }
  0x23   :  { %s930_s14 = smov [#allocation7]   ;;  %s876_s19 = scalar_lea.hbm %s1053_s2, 6144 }
  0x24   :  { %s41_s15 = sshll.u32 %s930_s14, 4  ;;  %p877_p2 = scmp.ne.s32.totalorder %s1053_s2, %s876_s19  ;;  %s42_s15 = int_to_ptr.vmem [resolvable:$true] %s41_s15 }
  0x25   :  { %p880_p3 = scmp.lt.u32.totalorder %s876_s19, %s1053_s2 }
  0x27   :  { %p882_p4 = pnand %p880_p3, %p877_p2 }
  0x29   :  { %885 = shalt.err (!%p882_p4)
}
  0x2a   :  { %s886_s24 = scalar_lea.vmem %s42_s15, 6144  ;;  %p891_p6 = scmp.lt.s32.totalorder %s42_s15, %s42_s15 }
  0x2b   :  { %p887_p5 = scmp.ne.s32.totalorder %s42_s15, %s886_s24  ;;  %p892_p7 = scmp.lt.s32.totalorder %s886_s24, %s886_s24 }
  0x2d   :  { %p893_p8 = por %p892_p7, %p891_p6 }
  0x2f   :  { %p894_p9 = pnand %p893_p8, %p887_p5 }
  0x31   :  { %897 = shalt.err (!%p894_p9)
}
  0x32   :  { %47 = dma.hbm_to_vmem [thread:$0]  %s1053_s2, 6144, %s42_s15, [#allocation6], %s928_s27, %s928_s27, %s929_s28  }
  0x33   :  { %920 = dma.done.wait [#allocation3], 256  }
  0x34   :  { %921 = vsyncadd [#allocation3], 4294967040 }
  0x35   :  { %922 = dma.done.wait [#allocation6], 6400  }
  0x36   :  { %923 = vsyncadd [#allocation6], 4294960896  ;;  %vm79_vm0 = vcmask 130048   ;;  %v1009_v0 = vld [vmem:[#allocation5] sm:$0xff]  ;;  %v1011_v1 = vld [vmem:[#allocation5 + $0x8] sm:$0xff]  ;;  %s931_s26 = smov [#allocation8]  }
  0x37   :  { %v1013_v2 = vld [vmem:[#allocation2] sm:$0xff]  ;;  %v718_v3 = vpack.c.bf16 %v1011_v1, %v1009_v0  ;;  %v163_v5 = vld [vmem:[#allocation7 + $0x88] sm:$0xff]  ;;  %673 = vmatprep.mubr.f32.mxu1 %v1009_v0  ;;  %v164_v7 = vld [vmem:[#allocation7 + $0x90] sm:$0xff]  ;;  %s519_s29 = sshll.u32 %s931_s26, 4  ;;  %s520_s29 = int_to_ptr.vmem [resolvable:$true] %s519_s29 }
  0x38   :  { %603 = vmatprep.mubr.msk.f32.mxu0 %vm79_vm0, %v1013_v2  ;;  %v162_v4 = vld [vmem:[#allocation7 + $0x80] sm:$0xff]  ;;  %v165_v8 = vld [vmem:[#allocation7 + $0x98] sm:$0xff]  ;;  %v1020_v9 = vld [vmem:[#allocation2 + $0x8] sm:$0xff]  ;;  %s898_s30 = scalar_lea.vmem %s520_s29, 256  ;;  %p903_p11 = scmp.lt.s32.totalorder %s520_s29, %s520_s29 }
  0x39   :  { %v722_v6 = vpack.c.bf16 %v163_v5, %v162_v4  ;;  %719 = vmatprep.subr.bf16.mxu0 %v718_v3  ;;  %v726_v10 = vpack.c.bf16 %v165_v8, %v164_v7  ;;  %v166_v11 = vld [vmem:[#allocation7 + $0xa0] sm:$0xff]  ;;  %v167_v12 = vld [vmem:[#allocation7 + $0xa8] sm:$0xff]  ;;  %v168_v14 = vld [vmem:[#allocation7 + $0xb0] sm:$0xff]  ;;  %p899_p10 = scmp.ne.s32.totalorder %s520_s29, %s898_s30  ;;  %p904_p12 = scmp.lt.s32.totalorder %s898_s30, %s898_s30 }
  0x3a   :  { %721 = vmatpush3.bf16.msra.mxu0 %v718_v3  ;;  %v730_v13 = vpack.c.bf16 %v167_v12, %v166_v11  ;;  %v169_v15 = vld [vmem:[#allocation7 + $0xb8] sm:$0xff]  ;;  %v170_v17 = vld [vmem:[#allocation7 + $0xc0] sm:$0xff]  ;;  %v171_v18 = vld [vmem:[#allocation7 + $0xc8] sm:$0xff] }
  0x3b   :  { %723 = vmatprep.subr.bf16.mxu0 %v722_v6  ;;  %v734_v16 = vpack.c.bf16 %v169_v15, %v168_v14  ;;  %v738_v19 = vpack.c.bf16 %v171_v18, %v170_v17  ;;  %v172_v20 = vld [vmem:[#allocation7 + $0xd0] sm:$0xff]  ;;  %v173_v21 = vld [vmem:[#allocation7 + $0xd8] sm:$0xff]  ;;  %v174_v23 = vld [vmem:[#allocation7 + $0xe0] sm:$0xff]  ;;  %p905_p13 = por %p904_p12, %p903_p11 }
  0x3c   :  { %v742_v22 = vpack.c.bf16 %v173_v21, %v172_v20  ;;  %v175_v24 = vld [vmem:[#allocation7 + $0xe8] sm:$0xff]  ;;  %v176_v26 = vld [vmem:[#allocation7 + $0xf0] sm:$0xff]  ;;  %v177_v27 = vld [vmem:[#allocation7 + $0xf8] sm:$0xff] }
  0x3d   :  { %604 = vmatmul.mubr.msk.f32.vlgmr.msra.gmra.mrb[0].mxu0 %vm79_vm0, %v1020_v9  ;;  %v746_v25 = vpack.c.bf16 %v175_v24, %v174_v23  ;;  %v750_v28 = vpack.c.bf16 %v177_v27, %v176_v26  ;;  %v61_v29 = vld [vmem:[#allocation7] sm:$0xff]  ;;  %v62_v30 = vld [vmem:[#allocation7 + $0x8] sm:$0xff]  ;;  %v63_v31 = vld [vmem:[#allocation7 + $0x10] sm:$0xff]  ;;  %p906_p0 = pnand %p905_p13, %p899_p10 }
  0x3e   :  { %725 = vmatpush3.bf16.msra.mxu0 %v722_v6  ;;  %v754_v32 = vpack.c.bf16 %v62_v30, %v61_v29  ;;  %v64_v33 = vld [vmem:[#allocation7 + $0x18] sm:$0xff]  ;;  %v65_v35 = vld [vmem:[#allocation7 + $0x20] sm:$0xff]  ;;  %v66_v36 = vld [vmem:[#allocation7 + $0x28] sm:$0xff] }
  0x3f   :  { %727 = vmatprep.subr.bf16.mxu0 %v726_v10  ;;  %v758_v34 = vpack.c.bf16 %v64_v33, %v63_v31  ;;  %v762_v37 = vpack.c.bf16 %v66_v36, %v65_v35  ;;  %v67_v38 = vld [vmem:[#allocation7 + $0x30] sm:$0xff]  ;;  %v68_v39 = vld [vmem:[#allocation7 + $0x38] sm:$0xff]  ;;  %v69_v41 = vld [vmem:[#allocation7 + $0x40] sm:$0xff] }
  0x40   :  { %755 = vmatprep.subr.bf16.mxu1 %v754_v32  ;;  %v766_v40 = vpack.c.bf16 %v68_v39, %v67_v38  ;;  %v70_v42 = vld [vmem:[#allocation7 + $0x48] sm:$0xff]  ;;  %v71_v44 = vld [vmem:[#allocation7 + $0x50] sm:$0xff]  ;;  %v72_v45 = vld [vmem:[#allocation7 + $0x58] sm:$0xff] }
  0x41   :  { %757 = vmatpush3.bf16.msra.mxu1 %v754_v32  ;;  %v770_v43 = vpack.c.bf16 %v70_v42, %v69_v41  ;;  %v774_v46 = vpack.c.bf16 %v72_v45, %v71_v44  ;;  %v73_v47 = vld [vmem:[#allocation7 + $0x60] sm:$0xff]  ;;  %v74_v48 = vld [vmem:[#allocation7 + $0x68] sm:$0xff]  ;;  %v75_v50 = vld [vmem:[#allocation7 + $0x70] sm:$0xff] }
  0x42   :  { %729 = vmatpush3.bf16.msra.mxu0 %v726_v10  ;;  %759 = vmatprep.subr.bf16.mxu1 %v758_v34  ;;  %v778_v49 = vpack.c.bf16 %v74_v48, %v73_v47  ;;  %v76_v51 = vld [vmem:[#allocation7 + $0x78] sm:$0xff]  ;;  %v408_v53 = vld [vmem:[#allocation7 + $0x100] sm:$0xff]  ;;  %v409_v54 = vld [vmem:[#allocation7 + $0x108] sm:$0xff] }
  0x43   :  { %731 = vmatprep.subr.bf16.mxu0 %v730_v13  ;;  %v782_v52 = vpack.c.bf16 %v76_v51, %v75_v50  ;;  %v790_v55 = vpack.c.bf16 %v409_v54, %v408_v53  ;;  %v410_v56 = vld [vmem:[#allocation7 + $0x110] sm:$0xff]  ;;  %v411_v57 = vld [vmem:[#allocation7 + $0x118] sm:$0xff]  ;;  %v412_v59 = vld [vmem:[#allocation7 + $0x120] sm:$0xff] }
  0x44   :  { %v794_v58 = vpack.c.bf16 %v411_v57, %v410_v56  ;;  %v413_v60 = vld [vmem:[#allocation7 + $0x128] sm:$0xff]  ;;  %v414_v62 = vld [vmem:[#allocation7 + $0x130] sm:$0xff]  ;;  %v415_v63 = vld [vmem:[#allocation7 + $0x138] sm:$0xff] }
  0x45   :  { %761 = vmatpush3.bf16.msra.mxu1 %v758_v34  ;;  %v798_v61 = vpack.c.bf16 %v413_v60, %v412_v59  ;;  %v802_v3 = vpack.c.bf16 %v415_v63, %v414_v62  ;;  %v416_v4 = vld [vmem:[#allocation7 + $0x140] sm:$0xff]  ;;  %v417_v5 = vld [vmem:[#allocation7 + $0x148] sm:$0xff]  ;;  %v418_v11 = vld [vmem:[#allocation7 + $0x150] sm:$0xff] }
  0x46   :  { %733 = vmatpush3.bf16.msra.mxu0 %v730_v13  ;;  %763 = vmatprep.subr.bf16.mxu1 %v762_v37  ;;  %v806_v6 = vpack.c.bf16 %v417_v5, %v416_v4  ;;  %v419_v12 = vld [vmem:[#allocation7 + $0x158] sm:$0xff]  ;;  %v420_v14 = vld [vmem:[#allocation7 + $0x160] sm:$0xff]  ;;  %v421_v15 = vld [vmem:[#allocation7 + $0x168] sm:$0xff] }
  0x47   :  { %735 = vmatprep.subr.bf16.mxu0 %v734_v16  ;;  %v810_v13 = vpack.c.bf16 %v419_v12, %v418_v11  ;;  %v422_v17 = vld [vmem:[#allocation7 + $0x170] sm:$0xff]  ;;  %v423_v18 = vld [vmem:[#allocation7 + $0x178] sm:$0xff]  ;;  %v536_v27 = vld [vmem:[%s1054_s3] ss:$0 sm:$0xff] }
  0x49   :  { %765 = vmatpush3.bf16.msra.mxu1 %v762_v37 }
  0x4a   :  { %737 = vmatpush3.bf16.msra.mxu0 %v734_v16  ;;  %767 = vmatprep.subr.bf16.mxu1 %v766_v40  ;;  %v814_v16 = vpack.c.bf16 %v421_v15, %v420_v14 }
  0x4b   :  { %739 = vmatprep.subr.bf16.mxu0 %v738_v19 }
  0x4d   :  { %769 = vmatpush3.bf16.msra.mxu1 %v766_v40 }
  0x4e   :  { %741 = vmatpush3.bf16.msra.mxu0 %v738_v19  ;;  %771 = vmatprep.subr.bf16.mxu1 %v770_v43  ;;  %v818_v19 = vpack.c.bf16 %v423_v18, %v422_v17 }
  0x4f   :  { %743 = vmatprep.subr.bf16.mxu0 %v742_v22 }
  0x51   :  { %773 = vmatpush3.bf16.msra.mxu1 %v770_v43 }
  0x52   :  { %745 = vmatpush3.bf16.msra.mxu0 %v742_v22  ;;  %775 = vmatprep.subr.bf16.mxu1 %v774_v46 }
  0x53   :  { %747 = vmatprep.subr.bf16.mxu0 %v746_v25 }
  0x55   :  { %777 = vmatpush3.bf16.msra.mxu1 %v774_v46 }
  0x56   :  { %749 = vmatpush3.bf16.msra.mxu0 %v746_v25  ;;  %779 = vmatprep.subr.bf16.mxu1 %v778_v49 }
  0x57   :  { %751 = vmatprep.subr.bf16.mxu0 %v750_v28 }
  0x59   :  { %781 = vmatpush3.bf16.msra.mxu1 %v778_v49 }
  0x5a   :  { %753 = vmatpush3.bf16.msra.mxu0 %v750_v28  ;;  %783 = vmatprep.subr.bf16.mxu1 %v782_v52 }
  0x5d   :  { %785 = vmatpush3.bf16.msra.mxu1 %v782_v52 }
  0x5e   :  { %791 = vmatprep.subr.bf16.mxu1 %v790_v55 }
  0x60   :  { %674 = vmatmul.mubr.f32.vlgmr.msra.gmra.mrb[0].mxu1 %v1011_v1 }
  0x61   :  { %793 = vmatpush3.bf16.msra.mxu1 %v790_v55 }
  0x62   :  { %795 = vmatprep.subr.bf16.mxu1 %v794_v58 }
  0x65   :  { %797 = vmatpush3.bf16.msra.mxu1 %v794_v58 }
  0x66   :  { %799 = vmatprep.subr.bf16.mxu1 %v798_v61 }
  0x69   :  { %801 = vmatpush3.bf16.msra.mxu1 %v798_v61 }
  0x6a   :  { %803 = vmatprep.subr.bf16.mxu1 %v802_v3 }
  0x6d   :  { %805 = vmatpush3.bf16.msra.mxu1 %v802_v3 }
  0x6e   :  { %807 = vmatprep.subr.bf16.mxu1 %v806_v6 }
  0x71   :  { %809 = vmatpush3.bf16.msra.mxu1 %v806_v6 }
  0x72   :  { %811 = vmatprep.subr.bf16.mxu1 %v810_v13 }
  0x75   :  { %813 = vmatpush3.bf16.msra.mxu1 %v810_v13 }
  0x76   :  { %815 = vmatprep.subr.bf16.mxu1 %v814_v16 }
  0x79   :  { %817 = vmatpush3.bf16.msra.mxu1 %v814_v16 }
  0x7a   :  { %819 = vmatprep.subr.bf16.mxu1 %v818_v19 }
  0x7d   :  { %821 = vmatpush3.bf16.msra.mxu1 %v818_v19 }
 0x110   :  { %v605_v7 = vpop.f32.mrb[0].mxu0 }
 0x111   :  { %v152_v8 = vpop.f32.mrb[1].mxu0 }
 0x112   :  { %v786_v10 = vpack.c.bf16 %v605_v7, %v152_v8  ;;  %638 = vmatprep.mubr.f32.mxu0 %v152_v8 }
 0x113   :  { %639 = vmatmul.mubr.f32.vlgmr.msra.gmra.mrb[2].mxu0 %v605_v7 }
 0x114   :  { %787 = vmatprep.subr.bf16.mxu0 %v786_v10  ;;  %680 = vmatprep.mubr.msk.f32.mxu0 %vm79_vm0, %v1013_v2 }
 0x115   :  { %789 = vmatpush3.bf16.msra.mxu0 %v786_v10 }
 0x118   :  { %681 = vmatmul.mubr.msk.f32.vlgmr.msra.gmra.mrb[4].mxu0 %vm79_vm0, %v1020_v9 }
 0x1e6   :  { %v640_v2 = vpop.f32.mrb[2].mxu0 }
 0x1e7   :  { %v244_v20 = vpop.f32.mrb[3].mxu0 }
 0x1eb   :  { %v682_v21 = vpop.f32.mrb[4].mxu0 }
 0x1ec   :  { %v404_v22 = vmul.f32 2.0, %v682_v21  ;;  %v394_v9 = vpop.f32.mrb[5].mxu0 }
 0x1ed   :  { %v403_v23 = vmul.f32 2.0, %v394_v9 }
 0x1ee   :  { %v406_v25 = vsub.f32 %v404_v22, %v1011_v1 }
 0x1ef   :  { %v405_v24 = vsub.f32 %v403_v23, %v1009_v0 }
 0x1f1   :  { %715 = vmatprep.mubr.f32.mxu1 %v405_v24 }
 0x1f2   :  { %716 = vmatmul.mubr.f32.vlgmr.msra.gmra.mrb[0].mxu1 %v406_v25 }
 0x2c5   :  { %v717_v26 = vpop.f32.mrb[0].mxu1 }
 0x2c6   :  { %v822_v28 = vadd.f32 %v717_v26, %v640_v2  ;;  %v490_v29 = vpop.f32.mrb[1].mxu1 }
 0x2c7   :  { %v823_v30 = vadd.f32 %v490_v29, %v244_v20 }
 0x2c8   :  { %v509_v31 = vadd.f32 %v822_v28, %v536_v27 }
 0x2c9   :  { %v508_v32 = vadd.f32 %v823_v30, %v536_v27 }
 0x2ca   :  { %v511_v33 = vadd.f32 %v509_v31, %v1011_v1 }
 0x2cb   :  { %v510_v34 = vadd.f32 %v508_v32, %v1009_v0 }
 0x2cc   :  { %513 = vst [vmem:[#allocation8 + $0x8] sm:$0xff] %v511_v33 }
 0x2cd   :  { %512 = vst [vmem:[#allocation8] sm:$0xff] %v510_v34 }
 0x2ce   :  { %909 = shalt.err (!%p906_p0)
}
 0x2cf   :  { %s910_s6 = scalar_lea.hbm %s1055_s4, 256 }
 0x2d0   :  { %p911_p1 = scmp.ne.s32.totalorder %s1055_s4, %s910_s6  ;;  %p914_p2 = scmp.lt.u32.totalorder %s910_s6, %s1055_s4 }
 0x2d2   :  { %p916_p3 = pnand %p914_p2, %p911_p1 }
 0x2d4   :  { %919 = shalt.err (!%p916_p3)
}
 0x2d5   :  { %525 = dma.vmem_to_hbm [thread:$0]  %s520_s29, 256, %s1055_s4, [#allocation4], %s928_s27, %s928_s27, %s929_s28  }
 0x2d6   :  { %924 = dma.done.wait [#allocation4], 256  }
 0x2d7   :  { %925 = vsyncadd [#allocation4], 4294967040 }
 0x2d8   :  { %529 = vsyncpa [#allocation3], 1 }
 0x2d9   :  { %530 = vsyncpa [#allocation6], 1 }
 0x2da   :  { %531 = vsyncpa [#allocation4], 1 }

</bundles_post_ra>
